<compile_context>
chip_gen: v5e
topology: v5e:2x2
jax: 0.10.0
libtpu: 0.0.40
codegen_flags: <defaults>
</compile_context>

<pallas_src>
import functools

import jax
import jax.numpy as jnp
from jax import lax
from jax.experimental import pallas as pl
from jax.experimental.pallas import tpu as pltpu


def _self_attn_kernel(x_ref, w1_ref, b1_ref, w2_ref, b2_ref, o_ref, *, valid_len):
    # x_ref : (nb, C, L_pad)           activations, lane-dense along L
    # w1_ref: (Crp, C)  b1_ref: (Crp, 1)   (Crp = Cr zero-padded to sublane multiple)
    # w2_ref: (C, Crp)  b2_ref: (C, 1)
    # o_ref : (nb, C, L_pad)
    nb = x_ref.shape[0]
    l_pad = x_ref.shape[2]

    w1 = w1_ref[...]
    w2 = w2_ref[...]
    b1 = b1_ref[...].astype(jnp.float32)
    b2 = b2_ref[...].astype(jnp.float32)
    mm_dtype = w1.dtype  # f32 (exact) or bf16 (fast path)

    # Keep the conv1 bias out of zero-padded L columns so S = h @ h^T is unaffected.
    if valid_len < l_pad:
        col = lax.broadcasted_iota(jnp.int32, (1, l_pad), 1)
        b1_cols = b1 * (col < valid_len).astype(jnp.float32)  # (Crp, L_pad)
    else:
        b1_cols = b1

    # nb is small and static; independent per-batch chains interleave on the MXU.
    for b in range(nb):
        x_b = x_ref[b]                                                     # (C, L_pad)
        # conv1 (1x1): channel-mixing matmul + bias, f32 accumulation.
        h = jnp.dot(w1, x_b, preferred_element_type=jnp.float32) + b1_cols  # (Crp, L_pad)
        h_mm = h.astype(mm_dtype)
        # S_b = h_b @ h_b^T, contraction on the lane axis (no explicit transpose op).
        s = lax.dot_general(h_mm, h_mm,
                            dimension_numbers=(((1,), (1,)), ((), ())),
                            preferred_element_type=jnp.float32)            # (Crp, Crp)
        # conv2 reassociated: out_b = (W2 @ S_b) @ h_b + b2.  W2@S_b is a tiny
        # (C x Crp x Crp) matmul, so the serial chain per batch is 3 short matmuls.
        w2s = jnp.dot(w2, s.astype(mm_dtype),
                      preferred_element_type=jnp.float32)                  # (C, Crp)
        out_b = jnp.dot(w2s.astype(mm_dtype), h_mm,
                        preferred_element_type=jnp.float32) + b2           # (C, L_pad)
        o_ref[b] = out_b.astype(o_ref.dtype)


def self_attention_module(x, w1, b1, w2, b2, *, batch_block=None,
                          compute_dtype=None, vmem_limit_bytes=None):
    """SelfAttentionModule forward.

    x : (B, C, L) float32
    w1: (Cr, C) conv1 weight (kernel_size=1 squeezed), b1: (Cr,)
    w2: (C, Cr) conv2 weight, b2: (C,)
    batch_block: batches per grid step. Default = largest divisor of B that is <= 8
      (bounds vreg live ranges and gives the pipeliner >1 step when B > 8).
      On v7x pass batch_block=B//2 so each TensorCore gets one "parallel" block.
    compute_dtype: jnp.float32 (default, exact parity) or jnp.bfloat16
      (halves HBM traffic / doubles MXU rate on v6e/v7x; f32 accumulation kept).
    vmem_limit_bytes: optional override of the scoped-VMEM limit for large blocks.
    """
    B, C, L = x.shape
    Cr = w1.shape[0]
    if compute_dtype is None:
        compute_dtype = jnp.float32

    # Sublane minimum for the padded hidden dim.
    sub = 16 if compute_dtype == jnp.bfloat16 else 8
    Crp = max(sub, pl.cdiv(Cr, sub) * sub)
    pad_cr = Crp - Cr

    # Pad L to a lane multiple so per-batch tiles are full (8,128) vregs and stores
    # are unmasked vst (biggest single layout lever).
    L_pad = pl.cdiv(L, 128) * 128

    if batch_block is None:
        batch_block = 1
        for cand in range(min(B, 8), 0, -1):
            if B % cand == 0:
                batch_block = cand
                break
    assert B % batch_block == 0, "batch_block must divide B"
    n_blocks = B // batch_block

    # Zero-padded params: padded W1 rows / b1 entries / W2 columns are exactly zero,
    # so the extra Crp - Cr rows of h (and rows/cols of S) are zero and results match.
    w1p = jnp.pad(w1, ((0, pad_cr), (0, 0))).astype(compute_dtype)
    b1p = jnp.pad(b1, ((0, pad_cr),)).reshape(Crp, 1).astype(jnp.float32)
    w2p = jnp.pad(w2, ((0, 0), (0, pad_cr))).astype(compute_dtype)
    b2c = b2.reshape(C, 1).astype(jnp.float32)

    x_p = x
    if L_pad != L:
        x_p = jnp.pad(x, ((0, 0), (0, 0), (0, L_pad - L)))
    x_p = x_p.astype(compute_dtype)

    kernel = functools.partial(_self_attn_kernel, valid_len=L)

    cp_kwargs = dict(dimension_semantics=("parallel",))
    if vmem_limit_bytes is not None:
        cp_kwargs["vmem_limit_bytes"] = vmem_limit_bytes

    out_p = pl.pallas_call(
        kernel,
        out_shape=jax.ShapeDtypeStruct((B, C, L_pad), x.dtype),
        grid=(n_blocks,),
        in_specs=[
            pl.BlockSpec((batch_block, C, L_pad), lambda i: (i, 0, 0)),  # activations
            pl.BlockSpec((Crp, C), lambda i: (0, 0)),                    # W1 (resident)
            pl.BlockSpec((Crp, 1), lambda i: (0, 0)),                    # b1
            pl.BlockSpec((C, Crp), lambda i: (0, 0)),                    # W2
            pl.BlockSpec((C, 1), lambda i: (0, 0)),                      # b2
        ],
        out_specs=pl.BlockSpec((batch_block, C, L_pad), lambda i: (i, 0, 0)),
        compiler_params=pltpu.CompilerParams(**cp_kwargs),
    )(x_p, w1p, b1p, w2p, b2c)

    if L_pad != L:
        out_p = out_p[:, :, :L]
    return out_p


def _reference(x, w1, b1, w2, b2):
    # Pure-JAX reference matching the PyTorch forward exactly.
    prec = lax.Precision.HIGHEST
    h = jnp.einsum("oc,bcl->bol", w1, x, precision=prec) + b1[None, :, None]  # conv1
    s = jnp.einsum("bol,bpl->bop", h, h, precision=prec)                      # f_conv1 @ f_conv1^T
    g = jnp.einsum("bop,bpl->bol", s, h, precision=prec)                      # f_sa @ f_conv1
    y = jnp.einsum("co,bol->bcl", w2, g, precision=prec) + b2[None, :, None]  # conv2
    return y


if __name__ == "__main__":
    # Small shapes consistent with the module: channels=16, r=4 -> hidden=4.
    B, C, L, r = 2, 16, 128, 4
    Cr = C // r

    key = jax.random.PRNGKey(0)
    kx, k1, k2, k3, k4 = jax.random.split(key, 5)

    x = jax.random.normal(kx, (B, C, L), dtype=jnp.float32)
    # Deterministic synthetic parameters (Conv1d k=1 weights squeezed to 2D).
    w1 = jax.random.normal(k1, (Cr, C), dtype=jnp.float32) * 0.1
    b1 = jax.random.normal(k2, (Cr,), dtype=jnp.float32) * 0.1
    w2 = jax.random.normal(k3, (C, Cr), dtype=jnp.float32) * 0.1
    b2 = jax.random.normal(k4, (C,), dtype=jnp.float32) * 0.1

    out = jax.block_until_ready(self_attention_module(x, w1, b1, w2, b2))
    ref = jax.block_until_ready(_reference(x, w1, b1, w2, b2))

    assert out.shape == (B, C, L), out.shape
    assert jnp.allclose(out, ref, atol=1e-3, rtol=1e-3), "mismatch vs reference"
    print("KERNEL_OK")
</pallas_src>

<mosaic_0001>
module attributes {stable_mosaic.version = 11 : i64} {
  func.func @_self_attn_kernel(%arg0: i32, %arg1: memref<2x16x128xf32, #tpu.memory_space<vmem>>, %arg2: memref<8x16xf32, #tpu.memory_space<vmem>>, %arg3: memref<8x1xf32, #tpu.memory_space<vmem>>, %arg4: memref<16x8xf32, #tpu.memory_space<vmem>>, %arg5: memref<16x1xf32, #tpu.memory_space<vmem>>, %arg6: memref<2x16x128xf32, #tpu.memory_space<vmem>>) attributes {dimension_semantics = [#tpu.dimension_semantics<parallel>], iteration_bounds = array<i64: 1>, scalar_prefetch = 0 : i64, scratch_operands = 0 : i64, tpu.core_type = #tpu.core_type<tc>, window_params = [{transform_indices = @transform_0, window_bounds = array<i64: 2, 16, 128>}, {pipeline_mode = #tpu.pipeline_mode<synchronous>, transform_indices = @transform_1, window_bounds = array<i64: 8, 16>}, {pipeline_mode = #tpu.pipeline_mode<synchronous>, transform_indices = @transform_2, window_bounds = array<i64: 8, 1>}, {pipeline_mode = #tpu.pipeline_mode<synchronous>, transform_indices = @transform_3, window_bounds = array<i64: 16, 8>}, {pipeline_mode = #tpu.pipeline_mode<synchronous>, transform_indices = @transform_4, window_bounds = array<i64: 16, 1>}, {transform_indices = @transform_5, window_bounds = array<i64: 2, 16, 128>}]} {
    %c0 = arith.constant 0 : index
    %c0_0 = arith.constant 0 : index
    %0 = vector.load %arg2[%c0, %c0_0] : memref<8x16xf32, #tpu.memory_space<vmem>>, vector<8x16xf32>
    %c0_1 = arith.constant 0 : index
    %c0_2 = arith.constant 0 : index
    %1 = vector.load %arg4[%c0_1, %c0_2] : memref<16x8xf32, #tpu.memory_space<vmem>>, vector<16x8xf32>
    %c0_3 = arith.constant 0 : index
    %c0_4 = arith.constant 0 : index
    %2 = vector.load %arg3[%c0_3, %c0_4] : memref<8x1xf32, #tpu.memory_space<vmem>>, vector<8x1xf32>
    %c0_5 = arith.constant 0 : index
    %c0_6 = arith.constant 0 : index
    %3 = vector.load %arg5[%c0_5, %c0_6] : memref<16x1xf32, #tpu.memory_space<vmem>>, vector<16x1xf32>
    %c0_7 = arith.constant 0 : index
    %c0_8 = arith.constant 0 : index
    %c0_9 = arith.constant 0 : index
    %4 = vector.load %arg1[%c0_7, %c0_8, %c0_9] : memref<2x16x128xf32, #tpu.memory_space<vmem>>, vector<1x16x128xf32>
    %5 = vector.shape_cast %4 : vector<1x16x128xf32> to vector<16x128xf32>
    %cst = arith.constant dense<0.000000e+00> : vector<8x128xf32>
    %6 = tpu.matmul %0, %5, %cst {dimension_numbers = #tpu.dot_dimension_numbers<[1], [0], [0], [1], [0, 0, 1, 1], [], []>} : vector<8x16xf32>, vector<16x128xf32>, vector<8x128xf32> -> vector<8x128xf32>
    %7 = vector.broadcast %2 : vector<8x1xf32> to vector<8x128xf32>
    %8 = arith.addf %6, %7 : vector<8x128xf32>
    %cst_10 = arith.constant dense<0.000000e+00> : vector<8x8xf32>
    %9 = tpu.matmul %8, %8, %cst_10 {dimension_numbers = #tpu.dot_dimension_numbers<[1], [1], [0], [0], [0, 0, 1, 0], [], []>} : vector<8x128xf32>, vector<8x128xf32>, vector<8x8xf32> -> vector<8x8xf32>
    %cst_11 = arith.constant dense<0.000000e+00> : vector<16x8xf32>
    %10 = tpu.matmul %1, %9, %cst_11 {dimension_numbers = #tpu.dot_dimension_numbers<[1], [0], [0], [1], [0, 0, 1, 1], [], []>} : vector<16x8xf32>, vector<8x8xf32>, vector<16x8xf32> -> vector<16x8xf32>
    %cst_12 = arith.constant dense<0.000000e+00> : vector<16x128xf32>
    %11 = tpu.matmul %10, %8, %cst_12 {dimension_numbers = #tpu.dot_dimension_numbers<[1], [0], [0], [1], [0, 0, 1, 1], [], []>} : vector<16x8xf32>, vector<8x128xf32>, vector<16x128xf32> -> vector<16x128xf32>
    %12 = vector.broadcast %3 : vector<16x1xf32> to vector<16x128xf32>
    %13 = arith.addf %11, %12 : vector<16x128xf32>
    %c0_13 = arith.constant 0 : index
    %c0_14 = arith.constant 0 : index
    %c0_15 = arith.constant 0 : index
    %14 = vector.load %arg6[%c0_13, %c0_14, %c0_15] : memref<2x16x128xf32, #tpu.memory_space<vmem>>, vector<1x16x128xf32>
    %15 = vector.shape_cast %14 : vector<1x16x128xf32> to vector<16x128xf32>
    %16 = vector.shape_cast %13 : vector<16x128xf32> to vector<1x16x128xf32>
    tpu.vector_store %arg6[%c0_13, %c0_14, %c0_15], %16 {strides = array<i32>} : memref<2x16x128xf32, #tpu.memory_space<vmem>>, vector<1x16x128xf32>,
    %c1 = arith.constant 1 : index
    %c0_16 = arith.constant 0 : index
    %c0_17 = arith.constant 0 : index
    %17 = vector.load %arg1[%c1, %c0_16, %c0_17] : memref<2x16x128xf32, #tpu.memory_space<vmem>>, vector<1x16x128xf32>
    %18 = vector.shape_cast %17 : vector<1x16x128xf32> to vector<16x128xf32>
    %cst_18 = arith.constant dense<0.000000e+00> : vector<8x128xf32>
    %19 = tpu.matmul %0, %18, %cst_18 {dimension_numbers = #tpu.dot_dimension_numbers<[1], [0], [0], [1], [0, 0, 1, 1], [], []>} : vector<8x16xf32>, vector<16x128xf32>, vector<8x128xf32> -> vector<8x128xf32>
    %20 = vector.broadcast %2 : vector<8x1xf32> to vector<8x128xf32>
    %21 = arith.addf %19, %20 : vector<8x128xf32>
    %cst_19 = arith.constant dense<0.000000e+00> : vector<8x8xf32>
    %22 = tpu.matmul %21, %21, %cst_19 {dimension_numbers = #tpu.dot_dimension_numbers<[1], [1], [0], [0], [0, 0, 1, 0], [], []>} : vector<8x128xf32>, vector<8x128xf32>, vector<8x8xf32> -> vector<8x8xf32>
    %cst_20 = arith.constant dense<0.000000e+00> : vector<16x8xf32>
    %23 = tpu.matmul %1, %22, %cst_20 {dimension_numbers = #tpu.dot_dimension_numbers<[1], [0], [0], [1], [0, 0, 1, 1], [], []>} : vector<16x8xf32>, vector<8x8xf32>, vector<16x8xf32> -> vector<16x8xf32>
    %cst_21 = arith.constant dense<0.000000e+00> : vector<16x128xf32>
    %24 = tpu.matmul %23, %21, %cst_21 {dimension_numbers = #tpu.dot_dimension_numbers<[1], [0], [0], [1], [0, 0, 1, 1], [], []>} : vector<16x8xf32>, vector<8x128xf32>, vector<16x128xf32> -> vector<16x128xf32>
    %25 = vector.broadcast %3 : vector<16x1xf32> to vector<16x128xf32>
    %26 = arith.addf %24, %25 : vector<16x128xf32>
    %c1_22 = arith.constant 1 : index
    %c0_23 = arith.constant 0 : index
    %c0_24 = arith.constant 0 : index
    %27 = vector.load %arg6[%c1_22, %c0_23, %c0_24] : memref<2x16x128xf32, #tpu.memory_space<vmem>>, vector<1x16x128xf32>
    %28 = vector.shape_cast %27 : vector<1x16x128xf32> to vector<16x128xf32>
    %29 = vector.shape_cast %26 : vector<16x128xf32> to vector<1x16x128xf32>
    tpu.vector_store %arg6[%c1_22, %c0_23, %c0_24], %29 {strides = array<i32>} : memref<2x16x128xf32, #tpu.memory_space<vmem>>, vector<1x16x128xf32>,
    return
  }
  func.func @transform_0(%arg0: i32) -> (i32, i32, i32) {
    %c0_i32 = arith.constant 0 : i32
    %c0_i32_0 = arith.constant 0 : i32
    %c0_i32_1 = arith.constant 0 : i32
    return %arg0, %c0_i32, %c0_i32_0 : i32, i32, i32
  }
  func.func @transform_1(%arg0: i32) -> (i32, i32) {
    %c0_i32 = arith.constant 0 : i32
    %c0_i32_0 = arith.constant 0 : i32
    %c0_i32_1 = arith.constant 0 : i32
    return %c0_i32, %c0_i32_0 : i32, i32
  }
  func.func @transform_2(%arg0: i32) -> (i32, i32) {
    %c0_i32 = arith.constant 0 : i32
    %c0_i32_0 = arith.constant 0 : i32
    %c0_i32_1 = arith.constant 0 : i32
    return %c0_i32, %c0_i32_0 : i32, i32
  }
  func.func @transform_3(%arg0: i32) -> (i32, i32) {
    %c0_i32 = arith.constant 0 : i32
    %c0_i32_0 = arith.constant 0 : i32
    %c0_i32_1 = arith.constant 0 : i32
    return %c0_i32, %c0_i32_0 : i32, i32
  }
  func.func @transform_4(%arg0: i32) -> (i32, i32) {
    %c0_i32 = arith.constant 0 : i32
    %c0_i32_0 = arith.constant 0 : i32
    %c0_i32_1 = arith.constant 0 : i32
    return %c0_i32, %c0_i32_0 : i32, i32
  }
  func.func @transform_5(%arg0: i32) -> (i32, i32, i32) {
    %c0_i32 = arith.constant 0 : i32
    %c0_i32_0 = arith.constant 0 : i32
    %c0_i32_1 = arith.constant 0 : i32
    return %arg0, %c0_i32, %c0_i32_0 : i32, i32, i32
  }
}

</mosaic_0001>

<bundles_post_ra>
// kernel: tpu_custom_call.1
= control target key start
LH: loop header
LB: loop body
LE: loop exit
PB: predicated region body
PF: predicated region fallthrough
CT: control target
= control target key end

     0   :  { %vm34_vm0 = vcmask 130048   ;;  %v311_v3 = vmov 0   ;;  %s388_s0 = inlined_call_operand.vmem [shape: f32[2,16,128], index: 0, kind: input, shape index: {}]   ;;  %s389_s1 = inlined_call_operand.vmem [shape: f32[8,16], index: 1, kind: input, shape index: {}]   ;;  %s390_s2 = inlined_call_operand.vmem [shape: f32[8,1], index: 2, kind: input, shape index: {}]   ;;  %s391_s3 = inlined_call_operand.vmem [shape: f32[16,8], index: 3, kind: input, shape index: {}]   ;;  %s392_s4 = inlined_call_operand.vmem [shape: f32[16,1], index: 4, kind: input, shape index: {}]   ;;  %s393_s5 = inlined_call_operand.hbm [shape: f32[2,16,128], index: 5, kind: output, shape index: {}]  }
   0x1   :  { %v28_v0 = vld [vmem:[%s388_s0 + $0x8] sm:$0xff]  ;;  %v27_v1 = vld [vmem:[%s388_s0] sm:$0xff]  ;;  %283 = vset.pattern.permute.xlu0 %v311_v3 }
   0x2   :  { %52 = vmatpush.msra.mxu0 %v28_v0  ;;  %v21_v2 = vld [vmem:[%s389_s1] sm:$0xff] }
   0x3   :  { %v24_v4 = vld [vmem:[%s390_s2] sm:$0xff] }
   0x4   :  { %10 = vsyncpa [#allocation3], 0  ;;  %31 = vperm.xlu0 %283, %v24_v4   ;;  %284 = vset.pattern.permute.xlu1 %v311_v3  ;;  %v25_v5 = vld [vmem:[%s392_s4] sm:$0xff]  ;;  %vm78_vm1 = vcmask 64512   ;;  %v271_v11 = vld [vmem:[%s388_s0 + $0x18] sm:$0xff]  ;;  %s313_s13 = smov 128  }
   0x5   :  { %53 = vmatpush.msra.mxu0 %v27_v1  ;;  %v22_v9 = vld [vmem:[%s391_s3] sm:$0xff]  ;;  %v270_v12 = vld [vmem:[%s388_s0 + $0x10] sm:$0xff]  ;;  %v23_v16 = vld [vmem:[%s391_s3 + $0x8] sm:$0xff]  ;;  %s312_s3 = smov [#allocation2]   ;;  %s314_s14 = smov 8  }
   0x6   :  { %265 = vmatmul.msk.f32.vlgmr.msra.gmra.mxu0 %vm34_vm0, %v21_v2  ;;  %v26_v22 = vld [vmem:[%s392_s4 + $0x8] sm:$0xff]  ;;  %s251_s10 = sshll.u32 %s312_s3, 4  ;;  %s253_s4 = sshll.u32 %s393_s5, 4  ;;  %s252_s10 = int_to_ptr.vmem [resolvable:$true] %s251_s10  ;;  %s254_s4 = int_to_ptr.hbm [resolvable:$true] %s253_s4 }
   0x7   :  { %115 = vperm.xlu1 %284, %v26_v22  }
   0xc   :  { %110 = vperm.xlu0 %283, %v25_v5  }
  0x76   :  { %v32_v6 = vpop.permute.xlu0 %31 }
  0x79   :  { %v116_v26 = vpop.permute.xlu1 %115 }
  0x7e   :  { %v111_v17 = vpop.permute.xlu0 %110 }
  0x83   :  { %v55_v7 = vpop.f32.mrf.mxu0 }
  0x84   :  { %v56_v8 = vadd.f32 %v55_v7, %v32_v6 }
  0x86   :  { %73 = vmatpush.xpose.msra.mxu1 %v56_v8  ;;  %278 = vmatpush.msra.mxu3 %v56_v8 }
  0x89   :  { %74 = vmatmul.f32.vlgmr.msra.gmra.mxu1 %v56_v8 }
  0x8a   :  { %139 = vmatpush.msrb.mxu1 %v56_v8 }
 0x106   :  { %v75_v10 = vpop.f32.mrf.mxu1 }
 0x107   :  { %100 = vmatpush.msrb.mxu0 %v75_v10  ;;  %277 = vmatpush.msra.mxu2 %v75_v10 }
 0x108   :  { %266 = vmatmul.msk.f32.vlgmr.msrb.gmra.mxu0 %vm78_vm1, %v22_v9  ;;  %267 = vmatmul.msk.f32.vlgmr.msra.gmra.mxu2 %vm78_vm1, %v23_v16 }
 0x109   :  { %166 = vmatpush.msra.mxu0 %v271_v11 }
 0x10b   :  { %167 = vmatpush.msra.mxu0 %v270_v12 }
 0x110   :  { %272 = vmatmul.msk.f32.vlgmr.msra.gmra.mxu0 %vm34_vm0, %v21_v2 }
 0x185   :  { %v102_v13 = vpop.f32.mrf.mxu0 }
 0x186   :  { %268 = vmatmul.msk.f32.vlgmr.msrb.gmra.mxu1 %vm78_vm1, %v102_v13 }
 0x18b   :  { %v105_v21 = vpop.f32.mrf.mxu2 }
 0x18c   :  { %269 = vmatmul.msk.f32.vlgmr.msra.gmra.mxu3 %vm78_vm1, %v105_v21 }
 0x18d   :  { %v169_v14 = vpop.f32.mrf.mxu0 }
 0x18e   :  { %v170_v15 = vadd.f32 %v169_v14, %v32_v6 }
 0x190   :  { %187 = vmatpush.xpose.msra.mxu1 %v170_v15  ;;  %236 = vmatpush.msrb.mxu3 %v170_v15 }
 0x193   :  { %188 = vmatmul.f32.vlgmr.msra.gmra.mxu1 %v170_v15 }
 0x203   :  { %v141_v18 = vpop.f32.mrf.mxu1 }
 0x204   :  { %v142_v19 = vadd.f32 %v141_v18, %v111_v17 }
 0x206   :  { %147 = vst [vmem:[#allocation2] sm:$0xff] %v142_v19 }
 0x20f   :  { %v144_v25 = vpop.f32.mrf.mxu3 }
 0x210   :  { %v189_v20 = vpop.f32.mrf.mxu1  ;;  %v145_v27 = vadd.f32 %v144_v25, %v116_v26 }
 0x211   :  { %207 = vmatpush.msrb.mxu2 %v189_v20 }
 0x212   :  { %273 = vmatmul.msk.f32.vlgmr.msrb.gmra.mxu2 %vm78_vm1, %v22_v9  ;;  %148 = vst [vmem:[#allocation2 + $0x8] sm:$0xff] %v145_v27 }
 0x21a   :  { %274 = vmatmul.msk.f32.gmra.mxu2 %vm78_vm1, %v23_v16 }
 0x295   :  { %v209_v23 = vpop.f32.mrf.mxu2 }
 0x296   :  { %275 = vmatmul.msk.f32.vlgmr.msrb.gmra.mxu3 %vm78_vm1, %v209_v23 }
 0x29d   :  { %v212_v24 = vpop.f32.mrf.mxu2 }
 0x29e   :  { %276 = vmatmul.msk.f32.gmra.mxu3 %vm78_vm1, %v212_v24 }
 0x319   :  { %v238_v28 = vpop.f32.mrf.mxu3 }
 0x31a   :  { %v239_v29 = vadd.f32 %v238_v28, %v111_v17 }
 0x31c   :  { %245 = vst [vmem:[#allocation2 + $0x10] sm:$0xff] %v239_v29 }
 0x321   :  { %v241_v30 = vpop.f32.mrf.mxu3 }
 0x322   :  { %v242_v31 = vadd.f32 %v241_v30, %v116_v26 }
 0x324   :  { %246 = vst [vmem:[#allocation2 + $0x18] sm:$0xff] %v242_v31 }
 0x325   :  { %259 = dma.vmem_to_hbm [thread:$0]  %s252_s10, 512, %s254_s4, [#allocation3], %s313_s13, %s313_s13, %s314_s14  }
 0x326   :  { %309 = dma.done.wait [#allocation3], 512  }
 0x327   :  { %310 = vsyncadd [#allocation3], 4294966784 }
 0x328   :  { %264 = vsyncpa [#allocation3], 1 }

</bundles_post_ra>
